<compile_context>
chip_gen: v5e
topology: v5e:2x2
jax: 0.10.0
libtpu: 0.0.40
codegen_flags: <defaults>
</compile_context>

<pallas_src>
from contextlib import contextmanager
import functools

import jax
import jax.numpy as jnp
from jax.experimental import pallas as pl
from jax.experimental.pallas import tpu as pltpu


def _round_up(x: int, m: int) -> int:
    return (x + m - 1) // m * m


def _tile_divisor(dim: int, pref: int, granule: int) -> int:
    """Largest multiple of `granule` that divides `dim` and is <= max(pref, granule).
    `dim` must already be a multiple of `granule`."""
    units = dim // granule
    limit = max(pref // granule, 1)
    best = 1
    for d in range(1, units + 1):
        if units % d == 0 and d <= limit:
            best = d
    return best * granule


@functools.lru_cache(maxsize=1)
def _tpu_tile_defaults():
    """Per-generation tile / VMEM-limit defaults (clamped per problem later)."""
    try:
        kind = jax.devices()[0].device_kind.lower()
    except Exception:  # pragma: no cover - defensive
        kind = ""
    if "v7" in kind or "7x" in kind:
        # 64 MiB VMEM, ~3.2 TB/s HBM: modest tiles reach the MXU roofline.
        return dict(tm=512, tn=768, tk=1024, vmem=48 * 1024 * 1024)
    if "v6" in kind:
        # balance ~680 flop/byte -> ~1k tiles; 128 MiB VMEM available.
        return dict(tm=1024, tn=1024, tk=1024, vmem=96 * 1024 * 1024)
    if "v5" in kind:
        # balance ~240 flop/byte; favor large tk (single vst slot on v5e).
        return dict(tm=512, tn=512, tk=1024, vmem=96 * 1024 * 1024)
    # Unknown device: conservative tiles / scoped-VMEM limit.
    return dict(tm=512, tn=512, tk=512, vmem=32 * 1024 * 1024)


# ----------------------------- Pallas kernels --------------------------------

def _elastic_linear_kernel_f32out(x_ref, w_ref, b_ref, o_ref):
    # x_ref: (tm, tk) f32/bf16   w_ref: (tk, tn) bf16   b_ref: (1, tn) f32
    # o_ref: (tm, tn) f32 -- used as the accumulator (resident across k).
    k = pl.program_id(2)

    @pl.when(k == 0)
    def _():
        o_ref[...] = jnp.zeros_like(o_ref)

    # bf16 x bf16 -> f32 accumulate on the MXU (x cast is a VPU no-op if bf16).
    o_ref[...] += jnp.dot(x_ref[...].astype(jnp.bfloat16), w_ref[...],
                          preferred_element_type=jnp.float32)

    @pl.when(k == pl.num_programs(2) - 1)
    def _():
        # f32 epilogue: bias + GELU in place on the resident f32 output tile.
        # TODO(synk): torch.nn.GELU defaults to exact erf; tanh approximation
        # (EUP tanh) is used since lax.erf has no guaranteed Mosaic lowering.
        o_ref[...] = jax.nn.gelu(o_ref[...] + b_ref[...],
                                 approximate=True).astype(o_ref.dtype)


def _elastic_linear_kernel_lowp(x_ref, w_ref, b_ref, o_ref, acc_ref):
    # Same as above but with a low-precision (e.g. bf16) output: keep an f32
    # VMEM accumulator, cast only at the final store.
    k = pl.program_id(2)

    @pl.when(k == 0)
    def _():
        acc_ref[...] = jnp.zeros_like(acc_ref)

    acc_ref[...] += jnp.dot(x_ref[...].astype(jnp.bfloat16), w_ref[...],
                            preferred_element_type=jnp.float32)

    @pl.when(k == pl.num_programs(2) - 1)
    def _():
        o_ref[...] = jax.nn.gelu(acc_ref[...] + b_ref[...],
                                 approximate=True).astype(o_ref.dtype)


# ------------------------------- wrapper --------------------------------------

def elastic_linear(x2d: jax.Array, w: jax.Array, b: jax.Array, *,
                   out_features: int | None = None,
                   out_dtype=jnp.float32,
                   tm: int | None = None, tn: int | None = None,
                   tk: int | None = None):
    """y = gelu(x2d @ w + b).

    x2d: (M, K) f32/bf16.
    w:   either (K, N) unpadded (any float dtype) or a cached, 128-padded bf16
         weight of shape (round_up(K,128), round_up(N,128)).
    b:   (1, N) or cached (1, round_up(N,128)) f32.
    """
    M, K = x2d.shape
    Kw, Nw = w.shape

    Kp = _round_up(K, 128)
    w_prepadded = (w.dtype == jnp.bfloat16 and Kw == Kp
                   and Kw % 128 == 0 and Nw % 128 == 0)
    if w_prepadded:
        # Cached weight path: no per-call pad/convert HBM pass.
        N = int(out_features) if out_features is not None else Nw
        Np = Nw
        w_p = w
    else:
        assert Kw == K, "weight K must match activation K"
        N = Nw
        Np = _round_up(N, 128)
        w_p = w
        if (Kp, Np) != (K, N):
            w_p = jnp.pad(w_p, ((0, Kp - K), (0, Np - N)))
        w_p = w_p.astype(jnp.bfloat16)

    # Bias: reuse cached padded f32 bias if provided.
    if b.dtype == jnp.float32 and b.ndim == 2 and b.shape == (1, Np):
        b_p = b
    else:
        b_p = b.reshape(1, -1).astype(jnp.float32)
        if b_p.shape[1] != Np:
            b_p = jnp.pad(b_p, ((0, 0), (0, Np - b_p.shape[1])))

    # ---- tile selection (per-generation defaults, clamped to problem) ----
    defaults = _tpu_tile_defaults()
    tm = defaults["tm"] if tm is None else tm
    tn = defaults["tn"] if tn is None else tn
    tk = defaults["tk"] if tk is None else tk

    Mp = _round_up(M, 16)                       # bf16 sublane packing
    tm = _tile_divisor(Mp, tm, 16)
    tn = _tile_divisor(Np, tn, 128)             # lane-dense output tiles
    tk = _tile_divisor(Kp, tk, 128)

    # Make sure >=2 independent (i, j) blocks exist so both TensorCores on
    # megacore parts (v7x) get work.
    if (Mp // tm) * (Np // tn) < 2:
        if tn % 256 == 0:
            tn //= 2
        elif tm % 32 == 0:
            tm //= 2

    grid = (Mp // tm, Np // tn, Kp // tk)

    # ---- activation prep: avoid pad/cast round trips where possible ----
    need_pad_x = (Mp != M) or (Kp != K)
    if need_pad_x:
        # Padding writes a copy anyway; write it at bf16 width.
        x_p = jnp.pad(x2d, ((0, Mp - M), (0, Kp - K))).astype(jnp.bfloat16)
    elif x2d.dtype == jnp.bfloat16:
        x_p = x2d
    elif grid[1] > 1:
        # x tiles re-read for every N block: one bf16 cast pass pays for itself.
        x_p = x2d.astype(jnp.bfloat16)
    else:
        # Each x tile is read exactly once: keep f32 in HBM, cast on the VPU
        # inside the kernel (hidden under the MXU).
        x_p = x2d
    x_bytes = 2 if x_p.dtype == jnp.bfloat16 else 4

    out_dt = jnp.dtype(out_dtype)
    cost = pl.CostEstimate(
        flops=2 * Mp * Kp * Np,
        transcendentals=Mp * Np,                              # tanh in GELU
        bytes_accessed=(grid[1] * Mp * Kp * x_bytes           # x re-read / N blk
                        + grid[0] * Kp * Np * 2               # w re-read / M blk
                        + Np * 4
                        + Mp * Np * out_dt.itemsize),
    )

    in_specs = [
        pl.BlockSpec((tm, tk), lambda i, j, k: (i, k)),       # x tile
        # NOTE: if the weight DMA is still exposed after enlarging tiles, try
        # pipeline_mode=pl.Buffered(3) here.
        pl.BlockSpec((tk, tn), lambda i, j, k: (k, j)),       # w tile
        pl.BlockSpec((1, tn), lambda i, j, k: (0, j)),        # bias tile
    ]
    out_spec = pl.BlockSpec((tm, tn), lambda i, j, k: (i, j))

    if out_dt == jnp.dtype(jnp.float32):
        kernel = _elastic_linear_kernel_f32out
        scratch = []                                          # o_ref is the acc
    else:
        kernel = _elastic_linear_kernel_lowp
        scratch = [pltpu.VMEM((tm, tn), jnp.float32)]         # f32 accumulator

    out = pl.pallas_call(
        kernel,
        out_shape=jax.ShapeDtypeStruct((Mp, Np), out_dt),
        grid_spec=pltpu.PrefetchScalarGridSpec(
            num_scalar_prefetch=0,
            grid=grid,
            in_specs=in_specs,
            out_specs=out_spec,
            scratch_shapes=scratch,
        ),
        compiler_params=pltpu.CompilerParams(
            dimension_semantics=("parallel", "parallel", "arbitrary"),
            vmem_limit_bytes=defaults["vmem"],
        ),
        cost_estimate=cost,
    )(x_p, w_p, b_p)

    if (Mp, Np) != (M, N):
        out = out[:M, :N]
    return out


# --------------------- ElasticModule control-flow port -----------------------

class MemoryController:
    """Minimal concrete MemoryController (constant mem_ratio)."""

    def __init__(self, mem_ratio: float = 0.5):
        self._mem_ratio = float(mem_ratio)
        self._last_input_size = None
        self._last_mem_ratio = []

    @contextmanager
    def record(self):
        yield

    def update_run_states(self, input_size=None, mem_ratio=None):
        if self._last_input_size is None:
            self._last_input_size = input_size
        elif self._last_input_size != input_size:
            raise ValueError(
                "Input size should not change for different ElasticModules.")
        self._last_mem_ratio.append(mem_ratio)

    def get_mem_ratio(self, input_size):
        return self._mem_ratio

    def state_dict(self):
        return {"mem_ratio": self._mem_ratio}

    def log(self):
        return f"mem_ratio={self._mem_ratio}"


class ElasticLinearModule:
    """Concrete ElasticModule: Linear + bias + GELU, matmul on the MXU."""

    def __init__(self, hidden: int, out: int, key, *, out_dtype=jnp.float32):
        k_w, k_b = jax.random.split(key)
        self.in_features = hidden
        self.out_features = out
        self.out_dtype = out_dtype
        # f32 master copies (the "torch parameters").
        self.w = (jax.random.normal(k_w, (hidden, out), jnp.float32)
                  / jnp.sqrt(hidden))
        self.b = jax.random.normal(k_b, (1, out), jnp.float32) * 0.01
        # Perf: pre-pad to lane multiples of 128 and pre-cast the weight to
        # bf16 ONCE, so each forward streams 2 bytes/elem of weight from HBM
        # with no per-call pad/convert kernel.
        kp = _round_up(hidden, 128)
        np_ = _round_up(out, 128)
        self.w_p = jnp.pad(self.w,
                           ((0, kp - hidden), (0, np_ - out))).astype(jnp.bfloat16)
        self.b_p = jnp.pad(self.b, ((0, 0), (0, np_ - out))).astype(jnp.float32)
        self._memory_controller = None
        self.training = True

    # --- ElasticModule API ---
    def register_memory_controller(self, memory_controller: MemoryController):
        self._memory_controller = memory_controller

    def _get_input_size(self, x):
        return int(x.shape[0] * x.shape[1])  # batch * seq tokens

    def _forward_with_mem_ratio(self, x, mem_ratio=0.0):
        # mem_ratio only governs activation-checkpointing in the original
        # implementation; it does not change the forward output.
        # TODO(synk): gradient-checkpointing split by mem_ratio is an
        # autodiff/memory policy with no in-kernel Pallas equivalent.
        B, S, H = x.shape
        y2d = elastic_linear(x.reshape(B * S, H), self.w_p, self.b_p,
                             out_features=self.out_features,
                             out_dtype=self.out_dtype)
        return mem_ratio, y2d.reshape(B, S, self.out_features)

    def forward(self, x, grad_enabled: bool = False):
        if (self._memory_controller is None or not grad_enabled
                or not self.training):
            _, ret = self._forward_with_mem_ratio(x)
        else:
            input_size = self._get_input_size(x)
            mem_ratio = self._memory_controller.get_mem_ratio(input_size)
            mem_ratio, ret = self._forward_with_mem_ratio(x, mem_ratio=mem_ratio)
            self._memory_controller.update_run_states(input_size, mem_ratio)
        return ret

    __call__ = forward


# ---------------------------------- main -------------------------------------

if __name__ == "__main__":
    key = jax.random.PRNGKey(0)
    k_x, k_p = jax.random.split(key)

    batch, seq, hidden, out = 2, 64, 256, 256   # M = 128, small but MXU-shaped
    x = jax.random.normal(k_x, (batch, seq, hidden), jnp.float32)

    module = ElasticLinearModule(hidden, out, k_p)
    module.register_memory_controller(MemoryController(mem_ratio=0.5))

    # "training" path with memory controller (mem_ratio bookkeeping exercised)
    y_train = module(x, grad_enabled=True)
    # "inference" path (controller bypassed)
    module.training = False
    y_eval = module(x, grad_enabled=False)

    x2d = x.reshape(-1, hidden)
    # Exercise the multi-block (2, 2, 2) grid / accumulate-into-output path
    # with raw (unpadded f32) weights going through the fallback prep.
    y_tiled = elastic_linear(x2d, module.w, module.b, tm=64, tn=128, tk=128)
    # Exercise the bf16-output (f32 VMEM accumulator) variant with cached
    # pre-padded bf16 weights.
    y_bf16 = elastic_linear(x2d, module.w_p, module.b_p, out_features=out,
                            out_dtype=jnp.bfloat16)

    jax.block_until_ready((y_train, y_eval, y_tiled, y_bf16))

    # Reference: same bf16-operand / f32-accumulate numerics, tanh GELU.
    ref2d = jax.nn.gelu(
        jnp.dot(x2d.astype(jnp.bfloat16), module.w.astype(jnp.bfloat16),
                preferred_element_type=jnp.float32) + module.b,
        approximate=True)
    ref = ref2d.reshape(batch, seq, out)

    assert jnp.allclose(y_train, ref, atol=2e-3, rtol=2e-3)
    assert jnp.allclose(y_eval, ref, atol=2e-3, rtol=2e-3)
    assert jnp.allclose(y_tiled, ref2d, atol=2e-3, rtol=2e-3)
    assert jnp.allclose(y_bf16.astype(jnp.float32), ref2d, atol=2e-2, rtol=2e-2)

    print("KERNEL_OK")
</pallas_src>

<mosaic_0001>
module attributes {stable_mosaic.version = 11 : i64} {
  func.func @_elastic_linear_kernel_f32out(%arg0: i32, %arg1: i32, %arg2: i32, %arg3: memref<128x256xbf16, #tpu.memory_space<vmem>>, %arg4: memref<256x128xbf16, #tpu.memory_space<vmem>>, %arg5: memref<1x128xf32, #tpu.memory_space<vmem>>, %arg6: memref<128x128xf32, #tpu.memory_space<vmem>>) attributes {dimension_semantics = [#tpu.dimension_semantics<parallel>, #tpu.dimension_semantics<parallel>, #tpu.dimension_semantics<arbitrary>], iteration_bounds = array<i64: 1, 2, 1>, scalar_prefetch = 0 : i64, scratch_operands = 0 : i64, tpu.core_type = #tpu.core_type<tc>, window_params = [{transform_indices = @transform_0, window_bounds = array<i64: 128, 256>}, {transform_indices = @transform_1, window_bounds = array<i64: 256, 128>}, {transform_indices = @transform_2, window_bounds = array<i64: 1, 128>}, {transform_indices = @transform_3, window_bounds = array<i64: 128, 128>}]} {
    %c0_i32 = arith.constant 0 : i32
    %0 = arith.cmpi eq, %arg2, %c0_i32 : i32
    %1 = arith.extui %0 : i1 to i32
    %c0_i32_0 = arith.constant 0 : i32
    %2 = arith.cmpi ne, %1, %c0_i32_0 : i32
    scf.if %2 {
      %cst_10 = arith.constant 0.000000e+00 : f32
      %12 = vector.broadcast %cst_10 : f32 to vector<128x128xf32>
      %c0_11 = arith.constant 0 : index
      %c0_12 = arith.constant 0 : index
      %13 = vector.load %arg6[%c0_11, %c0_12] : memref<128x128xf32, #tpu.memory_space<vmem>>, vector<128x128xf32>
      tpu.vector_store %arg6[%c0_11, %c0_12], %12 {strides = array<i32>} : memref<128x128xf32, #tpu.memory_space<vmem>>, vector<128x128xf32>,
    } else {
    }
    %c0 = arith.constant 0 : index
    %c0_1 = arith.constant 0 : index
    %3 = vector.load %arg6[%c0, %c0_1] : memref<128x128xf32, #tpu.memory_space<vmem>>, vector<128x128xf32>
    %c0_2 = arith.constant 0 : index
    %c0_3 = arith.constant 0 : index
    %4 = vector.load %arg3[%c0_2, %c0_3] : memref<128x256xbf16, #tpu.memory_space<vmem>>, vector<128x256xbf16>
    %c0_4 = arith.constant 0 : index
    %c0_5 = arith.constant 0 : index
    %5 = vector.load %arg4[%c0_4, %c0_5] : memref<256x128xbf16, #tpu.memory_space<vmem>>, vector<256x128xbf16>
    %cst = arith.constant dense<0.000000e+00> : vector<128x128xf32>
    %6 = tpu.matmul %4, %5, %cst {dimension_numbers = #tpu.dot_dimension_numbers<[1], [0], [0], [1], [0, 0, 1, 1], [], []>} : vector<128x256xbf16>, vector<256x128xbf16>, vector<128x128xf32> -> vector<128x128xf32>
    %7 = arith.addf %3, %6 : vector<128x128xf32>
    %c0_6 = arith.constant 0 : index
    %c0_7 = arith.constant 0 : index
    %8 = vector.load %arg6[%c0_6, %c0_7] : memref<128x128xf32, #tpu.memory_space<vmem>>, vector<128x128xf32>
    tpu.vector_store %arg6[%c0_6, %c0_7], %7 {strides = array<i32>} : memref<128x128xf32, #tpu.memory_space<vmem>>, vector<128x128xf32>,
    %c0_i32_8 = arith.constant 0 : i32
    %9 = arith.cmpi eq, %arg2, %c0_i32_8 : i32
    %10 = arith.extui %9 : i1 to i32
    %c0_i32_9 = arith.constant 0 : i32
    %11 = arith.cmpi ne, %10, %c0_i32_9 : i32
    scf.if %11 {
      %c0_10 = arith.constant 0 : index
      %c0_11 = arith.constant 0 : index
      %12 = vector.load %arg6[%c0_10, %c0_11] : memref<128x128xf32, #tpu.memory_space<vmem>>, vector<128x128xf32>
      %c0_12 = arith.constant 0 : index
      %c0_13 = arith.constant 0 : index
      %13 = vector.load %arg5[%c0_12, %c0_13] : memref<1x128xf32, #tpu.memory_space<vmem>>, vector<1x128xf32>
      %14 = vector.broadcast %13 : vector<1x128xf32> to vector<128x128xf32>
      %15 = arith.addf %12, %14 : vector<128x128xf32>
      %16 = arith.mulf %15, %15 : vector<128x128xf32>
      %17 = arith.mulf %15, %16 : vector<128x128xf32>
      %cst_14 = arith.constant 4.471500e-02 : f32
      %18 = vector.broadcast %cst_14 : f32 to vector<128x128xf32>
      %19 = arith.mulf %18, %17 : vector<128x128xf32>
      %20 = arith.addf %15, %19 : vector<128x128xf32>
      %cst_15 = arith.constant 0.797884583 : f32
      %21 = vector.broadcast %cst_15 : f32 to vector<128x128xf32>
      %22 = arith.mulf %21, %20 : vector<128x128xf32>
      %23 = math.tanh %22 : vector<128x128xf32>
      %cst_16 = arith.constant 1.000000e+00 : f32
      %24 = vector.broadcast %cst_16 : f32 to vector<128x128xf32>
      %25 = arith.addf %24, %23 : vector<128x128xf32>
      %cst_17 = arith.constant 5.000000e-01 : f32
      %26 = vector.broadcast %cst_17 : f32 to vector<128x128xf32>
      %27 = arith.mulf %26, %25 : vector<128x128xf32>
      %28 = arith.mulf %15, %27 : vector<128x128xf32>
      %c0_18 = arith.constant 0 : index
      %c0_19 = arith.constant 0 : index
      %29 = vector.load %arg6[%c0_18, %c0_19] : memref<128x128xf32, #tpu.memory_space<vmem>>, vector<128x128xf32>
      tpu.vector_store %arg6[%c0_18, %c0_19], %28 {strides = array<i32>} : memref<128x128xf32, #tpu.memory_space<vmem>>, vector<128x128xf32>,
    } else {
    }
    return
  }
  func.func @transform_0(%arg0: i32, %arg1: i32, %arg2: i32) -> (i32, i32) {
    %c0_i32 = arith.constant 0 : i32
    return %arg0, %arg2 : i32, i32
  }
  func.func @transform_1(%arg0: i32, %arg1: i32, %arg2: i32) -> (i32, i32) {
    %c0_i32 = arith.constant 0 : i32
    return %arg2, %arg1 : i32, i32
  }
  func.func @transform_2(%arg0: i32, %arg1: i32, %arg2: i32) -> (i32, i32) {
    %c0_i32 = arith.constant 0 : i32
    %c0_i32_0 = arith.constant 0 : i32
    return %c0_i32, %arg1 : i32, i32
  }
  func.func @transform_3(%arg0: i32, %arg1: i32, %arg2: i32) -> (i32, i32) {
    %c0_i32 = arith.constant 0 : i32
    return %arg0, %arg1 : i32, i32
  }
}

</mosaic_0001>

<bundles_post_ra>
// kernel: tpu_custom_call.1
= control target key start
LH: loop header
LB: loop body
LE: loop exit
PB: predicated region body
PF: predicated region fallthrough
CT: control target
= control target key end

     0   :  { %8 = vsyncpa [#allocation3], 0  ;;  %s1847_s0 = inlined_call_operand.hbm [shape: bf16[128,256], index: 0, kind: input, shape index: {}]   ;;  %s1848_s1 = inlined_call_operand.hbm [shape: bf16[256,256], index: 1, kind: input, shape index: {}]   ;;  %s1849_s2 = inlined_call_operand.hbm [shape: f32[1,256], index: 2, kind: input, shape index: {}]   ;;  %s1850_s3 = inlined_call_operand.hbm [shape: f32[128,256], index: 3, kind: output, shape index: {}]  }
   0x1   :  { %9 = vsyncpa [#allocation6], 0 }
   0x2   :  { %11 = vsyncpa [#allocation6 + $0x1], 0 }
   0x3   :  { %12 = vsyncpa [#allocation4], 0 }
   0x4   :  { %14 = vsyncpa [#allocation4 + $0x1], 0  ;;  %s1526_s12 = smov 0   ;;  %s1528_s13 = smov 0  }
   0x5   :  { %s1530_s14 = smov 0   ;;  %s1532_s15 = smov 0  }
   0x6   :  { %s1534_s16 = smov 0   ;;  %s1536_s17 = smov 0  }
   0x7 LB: > { %s35_s18 = sadd.s32 1, %s1492_s16  ;;  %s76_s19 = sadd.s32 1, %s1484_s14  ;;  %s1496_s17 = sphi %s1536_s17, %s20_s17   ;;  %s1492_s16 = sphi %s1534_s16, %s1861_s16   ;;  %s1488_s15 = sphi %s1532_s15, %s1860_s15   ;;  %s1484_s14 = sphi %s1530_s14, %s1859_s14   ;;  %s1480_s13 = sphi %s1528_s13, %s1858_s13   ;;  %s1476_s12 = sphi %s1526_s12, %s1857_s12  }
   0x8   : > { %p37_p0 = scmp.ge.s32.totalorder %s35_s18, 2  ;;  %p83_p1 = scmp.ne.s32.totalorder %s1484_s14, %s1480_s13 }
   0x9   : > { %p84_p2 = scmp.eq.s32.totalorder %s1496_s17, 0  ;;  %p1014_p4 = scmp.ge.s32.totalorder %s1496_s17, 2 }
   0xa   : > { %s1863_s18 = smov (%p37_p0, %s35_s18), 0  ;;  %p1227_p5 = scmp.lt.s32.totalorder %s1496_s17, 2 }
   0xb   : > { %p1566_p3 = por %p84_p2, %p83_p1  ;;  %s72_s21 = ssub.s32 %s1492_s16, %s1863_s18 }
   0xc   : > { %p74_p6 = scmp.eq.s32.totalorder %s72_s21, 0  ;;  %s187_s22 = sand.u32 1, %s1496_s17  }
   0xd   : > { %s189_s23 = sand.u32 1, %s1484_s14   ;;  %s1016_s26 = sshll.u32 %s1492_s16, 2 }
   0xe   : > { %s1577_s24 = scalar_select %p74_p6, %s1484_s14, %s76_s19  }
   0xf   : > { %s1015_s25 = sshll.u32 %s189_s23, 7  ;;  %s198_s29 = scalar_lea.hbm %s1848_s1, %s1016_s26 }
  0x10   : > { %s199_s30 = sshll.u32 %s198_s29, 4  ;;  %s191_s4 = scalar_lea.vmem [#allocation5], %s1015_s25  ;;  %s200_s30 = int_to_ptr.hbm [resolvable:$true] %s199_s30 }
  0x11   : > { %s201_s5 = sshll.u32 %s191_s4, 4  ;;  %p1589_p7 = pnand %p1227_p5, %p1566_p3  ;;  %s202_s5 = int_to_ptr.vmem [resolvable:$true] %s201_s5 }
  0x12   : > { %s1593_s7 = scalar_lea.sflag [#allocation6], %s187_s22  ;;  %s1498_s8 = smov 128  }
  0x13   : > { %s1499_s9 = smov 64   ;;  %s1500_s10 = smov 4  }
  0x14   : > { %1218 = dma.hbm_to_vmem [thread:$0]  (!%p1589_p7), %s200_s30, 2048, %s202_s5, %s1593_s7, %s1498_s8, %s1499_s9, %s1500_s10  }
  0x15   : > { %s1600_s11 = sadd.s32 4294967295, %s1496_s17   ;;  %s1011_s19 = sadd.s32 4294967294, %s1496_s17  }
  0x16   : > { %p89_p8 = scmp.ne.s32.totalorder %s1480_s13, %s1476_s12  ;;  %p90_p9 = scmp.eq.s32.totalorder %s1600_s11, 0 }
  0x17   : > { %p141_p10 = scmp.eq.s32.totalorder %s1600_s11, 1  ;;  %p147_p11 = scmp.eq.s32.totalorder %s1011_s19, 1 }
  0x18   : > { %p1609_p12 = por %p90_p9, %p89_p8  ;;  %p1012_p13 = scmp.ge.s32.totalorder %s1496_s17, 1 }
  0x19   : > { %p1617_p0 = por %p141_p10, %p83_p1  ;;  %p1621_p2 = por %p147_p11, %p89_p8 }
  0x1a   : > { %p154_p3 = scmp.lt.s32.totalorder %s1496_s17, 3  ;;  %s171_s27 = sshll.u32 %s1847_s0, 4  ;;  %s172_s27 = int_to_ptr.hbm [resolvable:$true] %s171_s27 }
  0x1b   : > { %s1501_s29 = smov [#allocation2]   ;;  %s217_s9 = scalar_lea.hbm %s1849_s2, %s1492_s16 }
  0x1c   : > { %p1629_p5 = pnand %p1012_p13, %p154_p3  ;;  %s173_s30 = sshll.u32 %s1501_s29, 4  ;;  %s174_s30 = int_to_ptr.vmem [resolvable:$true] %s173_s30 }
  0x1d   : > { %s219_s10 = sshll.u32 %s217_s9, 4  ;;  %s214_s19 = scalar_lea.vmem [#allocation7], %s189_s23  ;;  %s220_s10 = int_to_ptr.hbm [resolvable:$true] %s219_s10 }
  0x1e   : > { %p1211_p1 = pneg %p1629_p5  ;;  %s221_s25 = sshll.u32 %s214_s19, 4  ;;  %s222_s25 = int_to_ptr.vmem [resolvable:$true] %s221_s25 }
  0x1f   : > { %s1502_s26 = smov 8   ;;  %230 = sbr.rel (%p1629_p5) target bundleno = 294 (0x126), region = 32 }
  0x20   : > { %p1212_p6 = pnand %p1211_p1, %p90_p9 }
  0x21   : > { %1221 = dma.hbm_to_vmem [thread:$0]  (!%p1589_p7), %s220_s10, 16, %s222_s25, %s1593_s7  }
  0x22   : > { %1214 = dma.hbm_to_vmem [thread:$0]  (!%p1212_p6), %s172_s27, 2048, %s174_s30, [#allocation3], %s1498_s8, %s1498_s8, %s1502_s26  }
  0x24   : > { %1463 = dma.done.wait (%p90_p9), [#allocation3], 2048  }
  0x25   : > { %1465 = vsyncadd (%p90_p9), [#allocation3], 4294965248  ;;  %s237_s23 = sand.u32 1, %s1600_s11   ;;  %s1656_s29 = sand.u32 1, %s1480_s13  }
  0x26   : > { %s1019_s8 = sshll.u32 %s1656_s29, 7  ;;  %s238_s6 = scalar_lea.sflag [#allocation6], %s237_s23 }
  0x27   : > { %s1661_s7 = scalar_lea.vmem [#allocation5], %s1019_s8 }
  0x28   : > { %1467 = dma.done.wait (%p1609_p12), %s238_s6, 2064  }
  0x29   : > { %1469 = vsyncadd (%p1609_p12), %s238_s6, 4294965232  ;;  %v1176_v0 = vld [vmem:[%s1661_s7 + $0x38] sm:$0xff]  ;;  %v1175_v2 = vld [vmem:[%s1661_s7 + $0x30] sm:$0xff]  ;;  %s250_s11 = scalar_lea.vmem [#allocation7], %s1656_s29  ;;  %s1726_s20 = scalar_lea.vmem [#allocation8], %s1019_s8 }
  0x2a   : > { %v1184_v1 = vld [vmem:[%s1661_s7 + $0x78] sm:$0xff]  ;;  %542 = vmatpush.bf16.msra.mxu0 %v1176_v0  ;;  %1185 = vmatpush.bf16.msra.mxu2 %v1176_v0  ;;  %v1183_v3 = vld [vmem:[%s1661_s7 + $0x70] sm:$0xff]  ;;  %v1174_v4 = vld [vmem:[%s1661_s7 + $0x28] sm:$0xff]  ;;  %s1150_s27 = sshll.u32 %s1488_s15, 3  ;;  %s886_s5 = sshll.u32 %s1726_s20, 4  ;;  %s887_s5 = int_to_ptr.vmem [resolvable:$true] %s886_s5 }
  0x2b   : > { %591 = vmatpush.bf16.msra.mxu1 %v1184_v1  ;;  %1193 = vmatpush.bf16.msra.mxu3 %v1184_v1  ;;  %v1182_v5 = vld [vmem:[%s1661_s7 + $0x68] sm:$0xff]  ;;  %v1173_v6 = vld [vmem:[%s1661_s7 + $0x20] sm:$0xff]  ;;  %v1172_v8 = vld [vmem:[%s1661_s7 + $0x18] sm:$0xff]  ;;  %s885_s4 = scalar_lea.hbm %s1850_s3, %s1150_s27  ;;  %s872_s15 = scalar_lea.sflag [#allocation4], %s1656_s29 }
  0x2c   : > { %v1181_v7 = vld [vmem:[%s1661_s7 + $0x60] sm:$0xff]  ;;  %v1180_v9 = vld [vmem:[%s1661_s7 + $0x58] sm:$0xff]  ;;  %v1171_v10 = vld [vmem:[%s1661_s7 + $0x10] sm:$0xff]  ;;  %s888_s9 = sshll.u32 %s885_s4, 4  ;;  %s1430_s23 = scalar_lea.hbm %s1850_s3, 256  ;;  %s889_s9 = int_to_ptr.hbm [resolvable:$true] %s888_s9 }
  0x2d   : > { %v1179_v11 = vld [vmem:[%s1661_s7 + $0x50] sm:$0xff]  ;;  %v1170_v12 = vld [vmem:[%s1661_s7 + $0x8] sm:$0xff]  ;;  %v1169_v14 = vld [vmem:[%s1661_s7] sm:$0xff]  ;;  %s1424_s10 = sshra.s32 %s889_s9, 4  ;;  %s1425_s10 = int_to_ptr.hbm [resolvable:$true] %s1424_s10 }
  0x2e   : > { %543 = vmatpush.bf16.msra.mxu0 %v1175_v2  ;;  %1186 = vmatpush.bf16.msra.mxu2 %v1175_v2  ;;  %v1178_v13 = vld [vmem:[%s1661_s7 + $0x48] sm:$0xff]  ;;  %v1177_v15 = vld [vmem:[%s1661_s7 + $0x40] sm:$0xff]  ;;  %v1031_v28 = vld [vmem:[#allocation2 + $0x10] sm:$0xf]  ;;  %s1426_s19 = scalar_lea.hbm %s1425_s10, 128  ;;  %p1431_p10 = scmp.lt.s32.totalorder %s1425_s10, %s1850_s3 }
  0x2f   : > { %592 = vmatpush.bf16.msra.mxu1 %v1183_v3  ;;  %1194 = vmatpush.bf16.msra.mxu3 %v1183_v3  ;;  %v1023_v16 = vld [vmem:[#allocation2] sm:$0xf]  ;;  %v1154_v17 = vld [vmem:[#allocation2 + $0x4] sm:$0xf0]  ;;  %v1153_v20 = vld [vmem:[#allocation2 + $0x4] sm:$0xf]  ;;  %p1427_p7 = scmp.ne.s32.totalorder %s1425_s10, %s1426_s19  ;;  %p1432_p11 = scmp.lt.s32.totalorder %s1430_s23, %s1426_s19 }
  0x30   : > { %v1055_v18 = vld [vmem:[#allocation2 + $0x40] sm:$0xf]  ;;  %v1162_v19 = vld [vmem:[#allocation2 + $0x44] sm:$0xf0]  ;;  %v1025_v21 = vld [vmem:[#allocation2 + $0x8] sm:$0xf0]  ;;  %v1024_v24 = vor.u32 %v1154_v17, %v1023_v16 }
  0x31   : > { %v1161_v22 = vld [vmem:[#allocation2 + $0x44] sm:$0xf]  ;;  %v1057_v23 = vld [vmem:[#allocation2 + $0x48] sm:$0xf0]  ;;  %v1056_v25 = vor.u32 %v1162_v19, %v1055_v18  ;;  %v1028_v26 = vor.u32 %v1153_v20, %v1025_v21  ;;  %v1156_v29 = vld [vmem:[#allocation2 + $0x14] sm:$0xf0]  ;;  %p1428_p8 = pnand %p1427_p7, %p1617_p0  ;;  %p1433_p12 = por %p1432_p11, %p1431_p10 }
  0x32   : > { %544 = vmatpush.bf16.msra.mxu0 %v1174_v4  ;;  %1187 = vmatpush.bf16.msra.mxu2 %v1174_v4  ;;  %v1060_v27 = vor.u32 %v1161_v22, %v1057_v23  ;;  %v1063_v30 = vld [vmem:[#allocation2 + $0x50] sm:$0xf]  ;;  %v1164_v31 = vld [vmem:[#allocation2 + $0x54] sm:$0xf0]  ;;  %v1155_v32 = vld [vmem:[#allocation2 + $0x14] sm:$0xf]  ;;  %v1032_v36 = vor.u32 %v1156_v29, %v1031_v28 }
  0x33   : > { %593 = vmatpush.bf16.msra.mxu1 %v1182_v5  ;;  %1195 = vmatpush.bf16.msra.mxu3 %v1182_v5  ;;  %v1033_v33 = vld [vmem:[#allocation2 + $0x18] sm:$0xf0]  ;;  %v1163_v34 = vld [vmem:[#allocation2 + $0x54] sm:$0xf]  ;;  %v1064_v37 = vor.u32 %v1164_v31, %v1063_v30  ;;  %v1039_v40 = vld [vmem:[#allocation2 + $0x20] sm:$0xf]  ;;  %p1429_p9 = pneg %p1428_p8 }
  0x34   : > { %v1065_v35 = vld [vmem:[#allocation2 + $0x58] sm:$0xf0]  ;;  %v1036_v38 = vor.u32 %v1155_v32, %v1033_v33  ;;  %v1158_v41 = vld [vmem:[#allocation2 + $0x24] sm:$0xf0]  ;;  %v1071_v42 = vld [vmem:[#allocation2 + $0x60] sm:$0xf] }
  0x35   : > { %v1068_v39 = vor.u32 %v1163_v34, %v1065_v35  ;;  %v1166_v43 = vld [vmem:[#allocation2 + $0x64] sm:$0xf0]  ;;  %v1157_v44 = vld [vmem:[#allocation2 + $0x24] sm:$0xf]  ;;  %v1041_v45 = vld [vmem:[#allocation2 + $0x28] sm:$0xf0]  ;;  %v1040_v48 = vor.u32 %v1158_v41, %v1039_v40  ;;  %p1434_p13 = pnand %p1433_p12, %p1429_p9 }
  0x36   : > { %545 = vmatpush.bf16.msra.mxu0 %v1173_v6  ;;  %1188 = vmatpush.bf16.msra.mxu2 %v1173_v6  ;;  %v1165_v46 = vld [vmem:[#allocation2 + $0x64] sm:$0xf]  ;;  %v1073_v47 = vld [vmem:[#allocation2 + $0x68] sm:$0xf0]  ;;  %v1072_v49 = vor.u32 %v1166_v43, %v1071_v42  ;;  %v1044_v50 = vor.u32 %v1157_v44, %v1041_v45  ;;  %v1047_v52 = vld [vmem:[#allocation2 + $0x30] sm:$0xf] }
  0x37   : > { %594 = vmatpush.bf16.msra.mxu1 %v1181_v7  ;;  %1196 = vmatpush.bf16.msra.mxu3 %v1181_v7  ;;  %v1076_v51 = vor.u32 %v1165_v46, %v1073_v47  ;;  %v1160_v53 = vld [vmem:[#allocation2 + $0x34] sm:$0xf0]  ;;  %v1079_v54 = vld [vmem:[#allocation2 + $0x70] sm:$0xf]  ;;  %v1159_v56 = vld [vmem:[#allocation2 + $0x34] sm:$0xf] }
  0x38   : > { %v1168_v55 = vld [vmem:[#allocation2 + $0x74] sm:$0xf0]  ;;  %v1049_v57 = vld [vmem:[#allocation2 + $0x38] sm:$0xf0]  ;;  %v1167_v58 = vld [vmem:[#allocation2 + $0x74] sm:$0xf]  ;;  %v1048_v60 = vor.u32 %v1160_v53, %v1047_v52 }
  0x39   : > { %v1081_v59 = vld [vmem:[#allocation2 + $0x78] sm:$0xf0]  ;;  %v1080_v61 = vor.u32 %v1168_v55, %v1079_v54  ;;  %v1052_v62 = vor.u32 %v1159_v56, %v1049_v57  ;;  %v1686_v3 = vld [vmem:[%s250_s11] ss:$0 sm:$0xff] }
  0x3a   : > { %546 = vmatpush.bf16.msra.mxu0 %v1172_v8  ;;  %1189 = vmatpush.bf16.msra.mxu2 %v1172_v8  ;;  %v1084_v63 = vor.u32 %v1167_v58, %v1081_v59 }
  0x3b   : > { %595 = vmatpush.bf16.msra.mxu1 %v1180_v9  ;;  %1197 = vmatpush.bf16.msra.mxu3 %v1180_v9 }
  0x3e   : > { %547 = vmatpush.bf16.msra.mxu0 %v1171_v10  ;;  %1190 = vmatpush.bf16.msra.mxu2 %v1171_v10 }
  0x3f   : > { %596 = vmatpush.bf16.msra.mxu1 %v1179_v11  ;;  %1198 = vmatpush.bf16.msra.mxu3 %v1179_v11 }
  0x42   : > { %548 = vmatpush.bf16.msra.mxu0 %v1170_v12  ;;  %1191 = vmatpush.bf16.msra.mxu2 %v1170_v12 }
  0x43   : > { %597 = vmatpush.bf16.msra.mxu1 %v1178_v13  ;;  %1199 = vmatpush.bf16.msra.mxu3 %v1178_v13 }
  0x46   : > { %549 = vmatpush.bf16.msra.mxu0 %v1169_v14  ;;  %1192 = vmatpush.bf16.msra.mxu2 %v1169_v14 }
  0x47   : > { %598 = vmatpush.bf16.msra.mxu1 %v1177_v15  ;;  %1200 = vmatpush.bf16.msra.mxu3 %v1177_v15 }
  0x49   : > { %550 = vmatmul.bf16.vlgmr.msra.gmra.mxu0 %v1024_v24  ;;  %570 = vmatmul.bf16.vlgmr.msra.gmra.mxu2 %v1056_v25 }
  0x4a   : > { %599 = vmatmul.bf16.vlgmr.msra.gmra.mxu1 %v1028_v26  ;;  %619 = vmatmul.bf16.vlgmr.msra.gmra.mxu3 %v1060_v27 }
  0x59   : > { %555 = vmatmul.bf16.gmra.mxu0 %v1032_v36  ;;  %575 = vmatmul.bf16.gmra.mxu2 %v1064_v37 }
  0x5a   : > { %604 = vmatmul.bf16.gmra.mxu1 %v1036_v38  ;;  %624 = vmatmul.bf16.gmra.mxu3 %v1068_v39 }
  0x69   : > { %560 = vmatmul.bf16.gmra.mxu0 %v1040_v48  ;;  %580 = vmatmul.bf16.gmra.mxu2 %v1072_v49 }
  0x6a   : > { %609 = vmatmul.bf16.gmra.mxu1 %v1044_v50  ;;  %629 = vmatmul.bf16.gmra.mxu3 %v1076_v51 }
  0x79   : > { %565 = vmatmul.bf16.gmra.mxu0 %v1048_v60  ;;  %585 = vmatmul.bf16.gmra.mxu2 %v1080_v61 }
  0x7a   : > { %614 = vmatmul.bf16.gmra.mxu1 %v1052_v62  ;;  %634 = vmatmul.bf16.gmra.mxu3 %v1084_v63 }
  0xc6   : > { %v551_v0 = vpop.f32.mrf.mxu0 }
  0xc7   : > { %v600_v1 = vpop.f32.mrf.mxu1 }
  0xc8   : > { %v601_v2 = vadd.f32 %v600_v1, %v551_v0 }
  0xca   : > { %v695_v4 = vadd.f32 %v1686_v3, %v601_v2 }
  0xcc   : > { %v571_v5 = vpop.f32.mrf.mxu2  ;;  %v711_v7 = vmul.f32 %v695_v4, %v695_v4 }
  0xcd   : > { %v620_v6 = vpop.f32.mrf.mxu3 }
  0xce   : > { %v621_v8 = vadd.f32 %v620_v6, %v571_v5  ;;  %v553_v9 = vpop.f32.mrf.mxu0  ;;  %v727_v11 = vmul.f32 %v711_v7, %v695_v4 }
  0xcf   : > { %v602_v10 = vpop.f32.mrf.mxu1 }
  0xd0   : > { %v603_v12 = vadd.f32 %v602_v10, %v553_v9  ;;  %v743_v13 = vmul.f32 0.044715, %v727_v11  ;;  %v1690_v14 = vadd.f32 %v1686_v3, %v621_v8 }
  0xd2   : > { %v759_v15 = vadd.f32 %v743_v13, %v695_v4  ;;  %v719_v16 = vmul.f32 %v1690_v14, %v1690_v14  ;;  %v1695_v17 = vadd.f32 %v1686_v3, %v603_v12 }
  0xd4   : > { %v573_v18 = vpop.f32.mrf.mxu2  ;;  %v775_v20 = vmul.f32 0.7978846, %v759_v15  ;;  %v735_v21 = vmul.f32 %v719_v16, %v1690_v14  ;;  %v712_v22 = vmul.f32 %v1695_v17, %v1695_v17 }
  0xd5   : > { %v622_v19 = vpop.f32.mrf.mxu3 }
  0xd6   : > { %v623_v23 = vadd.f32 %v622_v19, %v573_v18  ;;  %v556_v24 = vpop.f32.mrf.mxu0  ;;  %1288 = vtanh.f32 %v775_v20  ;;  %v751_v26 = vmul.f32 0.044715, %v735_v21  ;;  %v728_v27 = vmul.f32 %v712_v22, %v1695_v17 }
  0xd7   : > { %v605_v25 = vpop.f32.mrf.mxu1 }
  0xd8   : > { %v606_v28 = vadd.f32 %v605_v25, %v556_v24  ;;  %v767_v29 = vadd.f32 %v751_v26, %v1690_v14  ;;  %v744_v30 = vmul.f32 0.044715, %v728_v27  ;;  %v1703_v31 = vadd.f32 %v1686_v3, %v623_v23 }
  0xda   : > { %v783_v32 = vmul.f32 0.7978846, %v767_v29  ;;  %v760_v33 = vadd.f32 %v744_v30, %v1695_v17  ;;  %v720_v34 = vmul.f32 %v1703_v31, %v1703_v31  ;;  %v1709_v36 = vadd.f32 %v1686_v3, %v606_v28 }
  0xdc   : > { %v576_v35 = vpop.f32.mrf.mxu2  ;;  %v1289_v38 = vpop.eup %1288  ;;  %1290 = vtanh.f32 %v783_v32  ;;  %v776_v39 = vmul.f32 0.7978846, %v760_v33  ;;  %v736_v40 = vmul.f32 %v720_v34, %v1703_v31  ;;  %v713_v44 = vmul.f32 %v1709_v36, %v1709_v36 }
  0xdd   : > { %v625_v37 = vpop.f32.mrf.mxu3  ;;  %v807_v43 = vadd.f32 1.0, %v1289_v38 }
  0xde   : > { %v626_v41 = vadd.f32 %v625_v37, %v576_v35  ;;  %v558_v42 = vpop.f32.mrf.mxu0  ;;  %1292 = vtanh.f32 %v776_v39  ;;  %v752_v46 = vmul.f32 0.044715, %v736_v40  ;;  %v729_v49 = vmul.f32 %v713_v44, %v1709_v36 }
  0xdf   : > { %v607_v45 = vpop.f32.mrf.mxu1  ;;  %v823_v48 = vmul.f32 0.5, %v807_v43 }
  0xe0   : > { %v608_v47 = vadd.f32 %v607_v45, %v558_v42  ;;  %v768_v50 = vadd.f32 %v752_v46, %v1703_v31  ;;  %v1717_v51 = vadd.f32 %v1686_v3, %v626_v41  ;;  %v745_v53 = vmul.f32 0.044715, %v729_v49 }
  0xe1   : > { %v839_v52 = vmul.f32 %v823_v48, %v695_v4 }
  0xe2   : > { %v1291_v54 = vpop.eup %1290  ;;  %v784_v55 = vmul.f32 0.7978846, %v768_v50  ;;  %v721_v56 = vmul.f32 %v1717_v51, %v1717_v51  ;;  %v1722_v57 = vadd.f32 %v1686_v3, %v608_v47  ;;  %v761_v60 = vadd.f32 %v745_v53, %v1709_v36 }
  0xe3   : > { %855 = vst [vmem:[%s1726_s20] sm:$0xff] %v839_v52  ;;  %v815_v59 = vadd.f32 1.0, %v1291_v54 }
  0xe4   : > { %v578_v58 = vpop.f32.mrf.mxu2  ;;  %v1293_v62 = vpop.eup %1292  ;;  %1294 = vtanh.f32 %v784_v55  ;;  %v737_v63 = vmul.f32 %v721_v56, %v1717_v51  ;;  %v714_v0 = vmul.f32 %v1722_v57, %v1722_v57  ;;  %v777_v6 = vmul.f32 0.7978846, %v761_v60 }
  0xe5   : > { %v627_v61 = vpop.f32.mrf.mxu3  ;;  %v831_v4 = vmul.f32 0.5, %v815_v59  ;;  %v808_v5 = vadd.f32 1.0, %v1293_v62 }
  0xe6   : > { %v628_v1 = vadd.f32 %v627_v61, %v578_v58  ;;  %v561_v2 = vpop.f32.mrf.mxu0  ;;  %v753_v8 = vmul.f32 0.044715, %v737_v63  ;;  %v730_v9 = vmul.f32 %v714_v0, %v1722_v57  ;;  %1296 = vtanh.f32 %v777_v6 }
  0xe7   : > { %v610_v7 = vpop.f32.mrf.mxu1  ;;  %v847_v11 = vmul.f32 %v831_v4, %v1690_v14  ;;  %v824_v12 = vmul.f32 0.5, %v808_v5 }
  0xe8   : > { %v611_v10 = vadd.f32 %v610_v7, %v561_v2  ;;  %v769_v13 = vadd.f32 %v753_v8, %v1717_v51  ;;  %v746_v15 = vmul.f32 0.044715, %v730_v9  ;;  %v1737_v16 = vadd.f32 %v1686_v3, %v628_v1 }
  0xe9   : > { %863 = vst [vmem:[%s1726_s20 + $0x40] sm:$0xff] %v847_v11  ;;  %v840_v18 = vmul.f32 %v824_v12, %v1695_v17 }
  0xea   : > { %v1295_v19 = vpop.eup %1294  ;;  %v785_v20 = vmul.f32 0.7978846, %v769_v13  ;;  %v762_v21 = vadd.f32 %v746_v15, %v1722_v57  ;;  %v722_v22 = vmul.f32 %v1737_v16, %v1737_v16  ;;  %v1745_v14 = vadd.f32 %v1686_v3, %v611_v10 }
  0xeb   : > { %856 = vst [vmem:[%s1726_s20 + $0x8] sm:$0xff] %v840_v18  ;;  %v816_v24 = vadd.f32 1.0, %v1295_v19 }
  0xec   : > { %v581_v23 = vpop.f32.mrf.mxu2  ;;  %1298 = vtanh.f32 %v785_v20  ;;  %v778_v26 = vmul.f32 0.7978846, %v762_v21  ;;  %v738_v27 = vmul.f32 %v722_v22, %v1737_v16  ;;  %v715_v17 = vmul.f32 %v1745_v14, %v1745_v14  ;;  %v1297_v29 = vpop.eup %1296 }
  0xed   : > { %v630_v25 = vpop.f32.mrf.mxu3  ;;  %v832_v30 = vmul.f32 0.5, %v816_v24  ;;  %v809_v34 = vadd.f32 1.0, %v1297_v29 }
  0xee   : > { %v563_v28 = vpop.f32.mrf.mxu0  ;;  %v631_v32 = vadd.f32 %v630_v25, %v581_v23  ;;  %1300 = vtanh.f32 %v778_v26  ;;  %v754_v35 = vmul.f32 0.044715, %v738_v27  ;;  %v731_v37 = vmul.f32 %v715_v17, %v1745_v14 }
  0xef   : > { %v612_v33 = vpop.f32.mrf.mxu1  ;;  %v848_v38 = vmul.f32 %v832_v30, %v1703_v31  ;;  %v825_v40 = vmul.f32 0.5, %v809_v34 }
  0xf0   : > { %v613_v39 = vadd.f32 %v612_v33, %v563_v28  ;;  %v770_v41 = vadd.f32 %v754_v35, %v1737_v16  ;;  %v747_v42 = vmul.f32 0.044715, %v731_v37  ;;  %v1756_v43 = vadd.f32 %v1686_v3, %v631_v32 }
  0xf1   : > { %864 = vst [vmem:[%s1726_s20 + $0x48] sm:$0xff] %v848_v38  ;;  %v841_v45 = vmul.f32 %v825_v40, %v1709_v36 }
  0xf2   : > { %v1299_v44 = vpop.eup %1298  ;;  %v786_v46 = vmul.f32 0.7978846, %v770_v41  ;;  %v763_v47 = vadd.f32 %v747_v42, %v1745_v14  ;;  %v723_v31 = vmul.f32 %v1756_v43, %v1756_v43  ;;  %v1763_v50 = vadd.f32 %v1686_v3, %v613_v39 }
  0xf3   : > { %v817_v49 = vadd.f32 1.0, %v1299_v44  ;;  %857 = vst [vmem:[%s1726_s20 + $0x10] sm:$0xff] %v841_v45 }
  0xf4   : > { %v583_v48 = vpop.f32.mrf.mxu2  ;;  %v1301_v53 = vpop.eup %1300  ;;  %1302 = vtanh.f32 %v786_v46  ;;  %v779_v54 = vmul.f32 0.7978846, %v763_v47  ;;  %v739_v59 = vmul.f32 %v723_v31, %v1756_v43  ;;  %v716_v60 = vmul.f32 %v1763_v50, %v1763_v50 }
  0xf5   : > { %v632_v52 = vpop.f32.mrf.mxu3  ;;  %v833_v36 = vmul.f32 0.5, %v817_v49  ;;  %v810_v58 = vadd.f32 1.0, %v1301_v53 }
  0xf6   : > { %v633_v55 = vadd.f32 %v632_v52, %v583_v48  ;;  %v566_v56 = vpop.f32.mrf.mxu0  ;;  %1304 = vtanh.f32 %v779_v54  ;;  %v755_v1 = vmul.f32 0.044715, %v739_v59  ;;  %v732_v2 = vmul.f32 %v716_v60, %v1763_v50 }
  0xf7   : > { %v615_v61 = vpop.f32.mrf.mxu1  ;;  %v849_v63 = vmul.f32 %v833_v36, %v1717_v51  ;;  %v826_v0 = vmul.f32 0.5, %v810_v58 }
  0xf8   : > { %v616_v62 = vadd.f32 %v615_v61, %v566_v56  ;;  %v1772_v4 = vadd.f32 %v1686_v3, %v633_v55  ;;  %v771_v6 = vadd.f32 %v755_v1, %v1756_v43  ;;  %v748_v7 = vmul.f32 0.044715, %v732_v2 }
  0xf9   : > { %865 = vst [vmem:[%s1726_s20 + $0x50] sm:$0xff] %v849_v63  ;;  %v842_v5 = vmul.f32 %v826_v0, %v1722_v57 }
  0xfa   : > { %v1303_v8 = vpop.eup %1302  ;;  %v724_v9 = vmul.f32 %v1772_v4, %v1772_v4  ;;  %v1780_v10 = vadd.f32 %v1686_v3, %v616_v62  ;;  %v787_v12 = vmul.f32 0.7978846, %v771_v6  ;;  %v764_v13 = vadd.f32 %v748_v7, %v1763_v50 }
  0xfb   : > { %858 = vst [vmem:[%s1726_s20 + $0x18] sm:$0xff] %v842_v5  ;;  %v818_v11 = vadd.f32 1.0, %v1303_v8 }
  0xfc   : > { %v586_v51 = vpop.f32.mrf.mxu2  ;;  %v1305_v18 = vpop.eup %1304  ;;  %v740_v57 = vmul.f32 %v724_v9, %v1772_v4  ;;  %v717_v19 = vmul.f32 %v1780_v10, %v1780_v10  ;;  %1306 = vtanh.f32 %v787_v12  ;;  %v780_v24 = vmul.f32 0.7978846, %v764_v13 }
  0xfd   : > { %v635_v15 = vpop.f32.mrf.mxu3  ;;  %v834_v22 = vmul.f32 0.5, %v818_v11  ;;  %v811_v23 = vadd.f32 1.0, %v1305_v18 }
  0xfe   : > { %v636_v20 = vadd.f32 %v635_v15, %v586_v51  ;;  %v568_v21 = vpop.f32.mrf.mxu0  ;;  %v756_v26 = vmul.f32 0.044715, %v740_v57  ;;  %v733_v27 = vmul.f32 %v717_v19, %v1780_v10  ;;  %1308 = vtanh.f32 %v780_v24 }
  0xff   : > { %v617_v25 = vpop.f32.mrf.mxu1  ;;  %v850_v28 = vmul.f32 %v834_v22, %v1737_v16  ;;  %v827_v29 = vmul.f32 0.5, %v811_v23 }
 0x100   : > { %v618_v17 = vadd.f32 %v617_v25, %v568_v21  ;;  %v772_v30 = vadd.f32 %v756_v26, %v1772_v4  ;;  %v749_v32 = vmul.f32 0.044715, %v733_v27  ;;  %v709_v33 = vadd.f32 %v1686_v3, %v636_v20 }
 0x101   : > { %866 = vst [vmem:[%s1726_s20 + $0x58] sm:$0xff] %v850_v28  ;;  %v843_v34 = vmul.f32 %v827_v29, %v1745_v14 }
 0x102   : > { %v788_v35 = vmul.f32 0.7978846, %v772_v30  ;;  %v765_v37 = vadd.f32 %v749_v32, %v1780_v10  ;;  %v725_v38 = vmul.f32 %v709_v33, %v709_v33  ;;  %v702_v39 = vadd.f32 %v1686_v3, %v618_v17  ;;  %v1307_v41 = vpop.eup %1306 }
 0x103   : > { %859 = vst [vmem:[%s1726_s20 + $0x20] sm:$0xff] %v843_v34  ;;  %v819_v42 = vadd.f32 1.0, %v1307_v41 }
 0x104   : > { %v588_v40 = vpop.f32.mrf.mxu2  ;;  %1310 = vtanh.f32 %v788_v35  ;;  %v781_v44 = vmul.f32 0.7978846, %v765_v37  ;;  %v741_v45 = vmul.f32 %v725_v38, %v709_v33  ;;  %v1309_v46 = vpop.eup %1308  ;;  %v718_v47 = vmul.f32 %v702_v39, %v702_v39 }
 0x105   : > { %v637_v16 = vpop.f32.mrf.mxu3  ;;  %v835_v49 = vmul.f32 0.5, %v819_v42  ;;  %v812_v14 = vadd.f32 1.0, %v1309_v46 }
 0x106   : > { %v638_v48 = vadd.f32 %v637_v16, %v588_v40  ;;  %1312 = vtanh.f32 %v781_v44  ;;  %v757_v31 = vmul.f32 0.044715, %v741_v45  ;;  %v734_v52 = vmul.f32 %v718_v47, %v702_v39 }
 0x107   : > { %v851_v53 = vmul.f32 %v835_v49, %v1756_v43  ;;  %v828_v54 = vmul.f32 0.5, %v812_v14 }
 0x108   : > { %v773_v55 = vadd.f32 %v757_v31, %v709_v33  ;;  %v750_v56 = vmul.f32 0.044715, %v734_v52  ;;  %v710_v36 = vadd.f32 %v1686_v3, %v638_v48 }
 0x109   : > { %867 = vst [vmem:[%s1726_s20 + $0x60] sm:$0xff] %v851_v53  ;;  %v844_v59 = vmul.f32 %v828_v54, %v1763_v50 }
 0x10a   : > { %v1311_v58 = vpop.eup %1310  ;;  %v789_v60 = vmul.f32 0.7978846, %v773_v55  ;;  %v766_v62 = vadd.f32 %v750_v56, %v702_v39  ;;  %v726_v63 = vmul.f32 %v710_v36, %v710_v36 }
 0x10b   : > { %v820_v61 = vadd.f32 1.0, %v1311_v58  ;;  %860 = vst [vmem:[%s1726_s20 + $0x28] sm:$0xff] %v844_v59 }
 0x10c   : > { %v1313_v0 = vpop.eup %1312  ;;  %1314 = vtanh.f32 %v789_v60  ;;  %v782_v2 = vmul.f32 0.7978846, %v766_v62  ;;  %v742_v5 = vmul.f32 %v726_v63, %v710_v36 }
 0x10d   : > { %v836_v1 = vmul.f32 0.5, %v820_v61  ;;  %v813_v43 = vadd.f32 1.0, %v1313_v0 }
 0x10e   : > { %1316 = vtanh.f32 %v782_v2  ;;  %v758_v50 = vmul.f32 0.044715, %v742_v5 }
 0x10f   : > { %v852_v3 = vmul.f32 %v836_v1, %v1772_v4  ;;  %v829_v6 = vmul.f32 0.5, %v813_v43 }
 0x110   : > { %v774_v8 = vadd.f32 %v758_v50, %v710_v36 }
 0x111   : > { %868 = vst [vmem:[%s1726_s20 + $0x68] sm:$0xff] %v852_v3  ;;  %v845_v7 = vmul.f32 %v829_v6, %v1780_v10 }
 0x112   : > { %v1315_v9 = vpop.eup %1314  ;;  %v790_v11 = vmul.f32 0.7978846, %v774_v8 }
 0x113   : > { %861 = vst [vmem:[%s1726_s20 + $0x30] sm:$0xff] %v845_v7  ;;  %v821_v51 = vadd.f32 1.0, %v1315_v9 }
 0x114   : > { %v1317_v12 = vpop.eup %1316  ;;  %1318 = vtanh.f32 %v790_v11 }
 0x115   : > { %v837_v13 = vmul.f32 0.5, %v821_v51  ;;  %v814_v15 = vadd.f32 1.0, %v1317_v12 }
 0x117   : > { %v853_v4 = vmul.f32 %v837_v13, %v709_v33  ;;  %v830_v18 = vmul.f32 0.5, %v814_v15 }
 0x119   : > { %869 = vst [vmem:[%s1726_s20 + $0x70] sm:$0xff] %v853_v4  ;;  %v846_v10 = vmul.f32 %v830_v18, %v702_v39 }
 0x11a   : > { %v1319_v57 = vpop.eup %1318 }
 0x11b   : > { %862 = vst [vmem:[%s1726_s20 + $0x38] sm:$0xff] %v846_v10  ;;  %v822_v19 = vadd.f32 1.0, %v1319_v57 }
 0x11d   : > { %v838_v20 = vmul.f32 0.5, %v822_v19 }
 0x11f   : > { %v854_v21 = vmul.f32 %v838_v20, %v710_v36 }
 0x121   : > { %870 = vst [vmem:[%s1726_s20 + $0x78] sm:$0xff] %v854_v21 }
 0x122   : > { %1437 = shalt.err (!%p1434_p13)
}
 0x123   : > { %s1503_s29 = smov 128   ;;  %s1504_s7 = smov 256  }
 0x124   : > { %s1505_s11 = smov 8  }
 0x125   : > { %1209 = dma.vmem_to_hbm [thread:$0]  (%p1617_p0), %s887_s5, 2048, %s889_s9, %s872_s15, %s1503_s29, %s1504_s7, %s1505_s11  }
 0x126 PF: > { %s903_s20 = sand.u32 1, %s1476_s12   ;;  %p1223_p3 = pnand %p1014_p4, %p1621_p2 }
 0x127   : > { %s904_s27 = scalar_lea.sflag [#allocation4], %s903_s20 }
 0x128   : > { %p1224_p5 = pneg %p1223_p3 }
 0x12a   : > { %1471 = dma.done.wait (%p1224_p5), %s904_s27, 2048  }
 0x12b   : > { %1473 = vsyncadd (%p1224_p5), %s904_s27, 4294965248  ;;  %s20_s17 = sadd.s32 1, %s1496_s17   ;;  %s1857_s12 = smov %s1480_s13 }
 0x12c   : > { %p17_p1 = scmp.ge.s32.totalorder %s20_s17, 4   ;;  %s1858_s13 = smov %s1484_s14 }
 0x12d   : > { %s1859_s14 = smov %s1577_s24  ;;  %s1860_s15 = smov %s1492_s16 }
 0x12e   : > { %s1861_s16 = smov %s1863_s18  ;;  %19 = sbr.rel (!%p17_p1) target bundleno = 7 (0x7), region = 102 }
 0x133   :  { %910 = vsyncpa [#allocation3], 1 }
 0x134   :  { %912 = vsyncpa [#allocation3 + $0x1], 1 }
 0x135   :  { %913 = vsyncpa [#allocation6], 1 }
 0x136   :  { %915 = vsyncpa [#allocation6 + $0x1], 1 }
 0x137   :  { %916 = vsyncpa [#allocation4], 1 }
 0x138   :  { %918 = vsyncpa [#allocation4 + $0x1], 1 }

</bundles_post_ra>
